<compile_context>
chip_gen: v7x
topology: tpu7x:2x2x1
jax: 0.10.0
libtpu: 0.0.40
codegen_flags: <defaults>
</compile_context>

<pallas_src>
import functools

import numpy as np
import jax
import jax.numpy as jnp
from jax import lax
from jax.experimental import pallas as pl
from jax.experimental.pallas import tpu as pltpu


# ---------------------------------------------------------------------------
# Build-time lowering of conv / pool layers to dense matrices (tiny, static)
# ---------------------------------------------------------------------------
def conv2d_as_matrix(w, Hin, Win, pad):
    """w: (Cout, Cin, kh, kw), stride 1.  Returns (Cin*Hin*Win, Cout*Hout*Wout)."""
    Cout, Cin, kh, kw = w.shape
    Hout = Hin + 2 * pad - kh + 1
    Wout = Win + 2 * pad - kw + 1
    M = np.zeros((Cin * Hin * Win, Cout * Hout * Wout), np.float32)
    for co in range(Cout):
        for ho in range(Hout):
            for wo in range(Wout):
                oidx = co * Hout * Wout + ho * Wout + wo
                for ci in range(Cin):
                    for dh in range(kh):
                        for dw in range(kw):
                            hi = ho + dh - pad
                            wi = wo + dw - pad
                            if 0 <= hi < Hin and 0 <= wi < Win:
                                iidx = ci * Hin * Win + hi * Win + wi
                                M[iidx, oidx] += w[co, ci, dh, dw]
    return M, Hout, Wout


def convT2d_as_matrix(w, Hin, Win, stride):
    """w: (Cin, Cout, kh, kw), padding 0.  Returns (Cin*Hin*Win, Cout*Hout*Wout)."""
    Cin, Cout, kh, kw = w.shape
    Hout = (Hin - 1) * stride + kh
    Wout = (Win - 1) * stride + kw
    M = np.zeros((Cin * Hin * Win, Cout * Hout * Wout), np.float32)
    for ci in range(Cin):
        for hi in range(Hin):
            for wi in range(Win):
                iidx = ci * Hin * Win + hi * Win + wi
                for co in range(Cout):
                    for dh in range(kh):
                        for dw in range(kw):
                            ho = hi * stride + dh
                            wo = wi * stride + dw
                            oidx = co * Hout * Wout + ho * Wout + wo
                            M[iidx, oidx] += w[ci, co, dh, dw]
    return M, Hout, Wout


def maxpool2_selects(C, Hin, Win):
    """MaxPool2d(2): 4 one-hot selection matrices, pooled = max_k (x @ S_k)."""
    Hout, Wout = Hin // 2, Win // 2
    S = np.zeros((4, C * Hin * Win, C * Hout * Wout), np.float32)
    k = 0
    for dh in range(2):
        for dw in range(2):
            for c in range(C):
                for ho in range(Hout):
                    for wo in range(Wout):
                        hi, wi = 2 * ho + dh, 2 * wo + dw
                        S[k, c * Hin * Win + hi * Win + wi,
                          c * Hout * Wout + ho * Wout + wo] = 1.0
            k += 1
    return S, Hout, Wout


def build_kernel_weights(p, matmul_dtype=jnp.bfloat16):
    """Lower all layers to matmuls, fold maxpools into the convs, fold fc_d into fc_e,
    and pack into one (176,128) weight slab (16-aligned row offsets) + one (8,128) f32
    bias slab."""
    # Encoder stage 1: Conv2d(1,2,k=2,p=1) on (1,24,1) -> (2,25,2); MaxPool2 -> (2,12,1)
    M1, H1, W1 = conv2d_as_matrix(p["conv1_w"], 24, 1, pad=1)           # (24, 100)
    b1 = np.repeat(p["conv1_b"], H1 * W1)                               # (100,)
    S1, H1p, W1p = maxpool2_selects(2, H1, W1)                          # (4, 100, 24)
    # relu monotone + one-hot select columns  =>  fold is exact.
    W1cat = np.concatenate([M1 @ S1[k] for k in range(4)], axis=1)      # (24, 96)
    b1cat = np.concatenate([b1 @ S1[k] for k in range(4)])              # (96,)

    # Encoder stage 2: Conv2d(2,4,k=2,p=1) on (2,12,1) -> (4,13,2); MaxPool2 -> (4,6,1)
    M2, H2, W2 = conv2d_as_matrix(p["conv2_w"], H1p, W1p, pad=1)        # (24, 104)
    b2 = np.repeat(p["conv2_b"], H2 * W2)                               # (104,)
    S2, _, _ = maxpool2_selects(4, H2, W2)                              # (4, 104, 24)
    W2cat = np.concatenate([M2 @ S2[k] for k in range(4)], axis=1)      # (24, 96)
    b2cat = np.concatenate([b2 @ S2[k] for k in range(4)])              # (96,)

    # Fused fc block: enc = p2@We + be   (output lanes 96:104)
    #                 d1pre = p2@(We@Wd1) + (be@Wd1 + bd)   (output lanes 104:128)
    We = p["fc_e_w"].T                                                  # (24, 8)
    Wd1 = p["fc_d_w"].T                                                 # (8, 24)
    Wfc = np.zeros((24, 128), np.float32)
    Wfc[:, 96:104] = We
    Wfc[:, 104:128] = We @ Wd1
    bfc = np.zeros(128, np.float32)
    bfc[96:104] = p["fc_e_b"]
    bfc[104:128] = p["fc_e_b"] @ Wd1 + p["fc_d_b"]

    # Decoder ConvT stages
    Md2, Hd2, Wd2 = convT2d_as_matrix(p["ct1_w"], 6, 1, 2)              # (24, 48)
    bd2 = np.repeat(p["ct1_b"], Hd2 * Wd2)                              # (48,)
    Md3, Hd3, Wd3 = convT2d_as_matrix(p["ct2_w"], Hd2, Wd2, 2)          # (48, 96)
    bd3 = np.repeat(p["ct2_b"], Hd3 * Wd3)                              # (96,)
    Md3_128 = np.zeros((48, 128), np.float32)                           # widen to N=128
    Md3_128[:, 0:96] = Md3
    bd3_128 = np.zeros(128, np.float32)
    bd3_128[0:96] = bd3

    # Single lane-dense weight slab; row offsets 0/32/64/96/128 are all 16-aligned so
    # bf16 sublane packs never start mid-pack.
    wslab = np.zeros((176, 128), np.float32)
    wslab[0:24, 0:96] = W1cat
    wslab[32:56, 0:96] = W2cat
    wslab[64:88, :] = Wfc
    wslab[96:120, 0:48] = Md2
    wslab[128:176, :] = Md3_128

    # Single f32 bias slab (bias-add / relu / max stay f32: v5e VPU has no bf16 ALU).
    bslab = np.zeros((8, 128), np.float32)
    bslab[0, 0:96] = b1cat
    bslab[1, 0:96] = b2cat
    bslab[2, :] = bfc
    bslab[3, 0:48] = bd2
    bslab[4, :] = bd3_128

    return jnp.asarray(wslab, matmul_dtype), jnp.asarray(bslab, jnp.float32)


# ---------------------------------------------------------------------------
# Pallas kernel: whole AutoEncoder forward on one (TB, 24) batch tile, chunked
# ---------------------------------------------------------------------------
def ae_kernel(x_ref, w_ref, b_ref, out_ref, *, ch):
    """w_ref: (176,128) weight slab (bf16 or f32). b_ref: (8,128) f32 bias slab.
    out_ref: (TB,128) lane-dense output: decoded in lanes 0:96, encoded in 96:104
    (lanes 104:128 hold d1's pre-activation; never read by the wrapper)."""
    f32 = jnp.float32
    wdt = w_ref.dtype  # matmul operand dtype (bf16 fast path, f32 exact path)

    # Bias rows hoisted out of the chunk loop (a handful of vregs, reused every chunk).
    b1 = b_ref[0:1, 0:96]
    b2 = b_ref[1:2, 0:96]
    bfc = b_ref[2:3, 0:128]
    bd2 = b_ref[3:4, 0:48]
    bd3 = b_ref[4:5, 0:128]

    def mm(a, r0, r1, n):
        # MXU matmul against a static slice of the weight slab; f32 accumulation.
        return jnp.dot(a.astype(wdt), w_ref[r0:r1, 0:n],
                       preferred_element_type=f32)

    def gmax(z):
        # max over the 4 folded pool windows, laid out as 4 groups of 24 lanes.
        return jnp.maximum(jnp.maximum(z[:, 0:24], z[:, 24:48]),
                           jnp.maximum(z[:, 48:72], z[:, 72:96]))

    nchunks = x_ref.shape[0] // ch

    def chunk(c, carry):
        r0 = pl.multiple_of(c * ch, ch)
        x = x_ref[pl.ds(r0, ch), :]                                        # (ch, 24)

        # --- encoder: [Conv1+ReLU+Pool], [Conv2+ReLU+Pool] (pool folded) ---
        p1 = gmax(jnp.maximum(mm(x, 0, 24, 96) + b1, 0.0))                 # (ch, 24)
        p2 = gmax(jnp.maximum(mm(p1, 32, 56, 96) + b2, 0.0))               # (ch, 24)

        # --- fused fc_e+fc_d: enc in lanes 96:104, pre-activation d1 in 104:128 ---
        z = mm(p2, 64, 88, 128) + bfc                                      # (ch, 128)
        d1 = jnp.maximum(z[:, 104:128], 0.0)                               # (ch, 24)

        # --- decoder: ConvT(4->2,s=2)+ReLU, ConvT(2->1,s=2) (RHS widened to 128) ---
        d2 = jnp.maximum(mm(d1, 96, 120, 48) + bd2, 0.0)                   # (ch, 48)
        dec = mm(d2, 128, 176, 128) + bd3                                  # (ch, 128)

        # dec lanes 96:128 are zero; z lanes 0:96 are zero; so a single add yields
        # decoded|encoded|(ignored d1pre) and ONE full-width unmasked store per chunk.
        out_ref[pl.ds(r0, ch), :] = (dec + z).astype(out_ref.dtype)
        return carry

    lax.fori_loop(0, nchunks, chunk, 0, unroll=True)


# ---------------------------------------------------------------------------
# Wrapper
# ---------------------------------------------------------------------------
def _round_up(n, m):
    return ((n + m - 1) // m) * m


def _plan_tiling(B, ch_max=128, tb_max=1024):
    """Pick (batch_tile TB, row_chunk CH, padded_batch Bp).  Large TB amortizes the
    ~0.35us per-grid-step overhead; an even (>=2) step count feeds both v7x TensorCores
    via the 'parallel' batch axis; TB is a multiple of CH so the in-kernel fori_loop has
    a static trip count."""
    ch = min(ch_max, _round_up(max(B, 1), 8))
    b = _round_up(max(B, 1), ch)
    steps = max(1, -(-b // tb_max))          # ceil(b / tb_max)
    if b >= 256:
        steps = max(steps, 2)                # give both v7x cores work
    if steps > 1 and steps % 2:
        steps += 1                           # even step count for v7x megacore
    tb = _round_up(-(-b // steps), ch)
    return tb, ch, steps * tb


def autoencoder_forward(x, wslab, bslab, *, ch_max=128, tb_max=1024, out_dtype=None):
    """x: (B, 1, 24, 1) float32 NCHW. Returns (decoded (B,1,24,4), encoded (B,8)).
    Output dtype follows the weight slab (bf16 fast path / f32 exact path) unless
    out_dtype is given."""
    B = x.shape[0]
    if out_dtype is None:
        out_dtype = jnp.bfloat16 if wslab.dtype == jnp.bfloat16 else jnp.float32

    x_flat = x.reshape(B, -1).astype(jnp.float32)          # C-major flatten -> (B, 24)
    TB, CH, Bp = _plan_tiling(B, ch_max, tb_max)
    if Bp == B:
        x_in = x_flat                                      # skip pad+copy when aligned
    else:
        x_in = jnp.zeros((Bp, 24), jnp.float32).at[:B].set(x_flat)

    # flops per batch row: 2 * sum(K*N) over the 5 matmuls
    kn_sum = 24 * 96 + 24 * 96 + 24 * 128 + 24 * 48 + 48 * 128
    cost = pl.CostEstimate(
        flops=2 * Bp * kn_sum,
        transcendentals=0,
        bytes_accessed=int(wslab.size * wslab.dtype.itemsize + bslab.size * 4
                           + Bp * (24 * 4 + 128 * jnp.dtype(out_dtype).itemsize)))

    out = pl.pallas_call(
        functools.partial(ae_kernel, ch=CH),
        grid=(Bp // TB,),
        in_specs=[pl.BlockSpec((TB, 24), lambda i: (i, 0)),
                  pl.BlockSpec(wslab.shape, lambda i: (0, 0)),
                  pl.BlockSpec(bslab.shape, lambda i: (0, 0))],
        out_specs=pl.BlockSpec((TB, 128), lambda i: (i, 0)),
        out_shape=jax.ShapeDtypeStruct((Bp, 128), out_dtype),
        compiler_params=pltpu.CompilerParams(dimension_semantics=("parallel",)),
        cost_estimate=cost,
    )(x_in, wslab, bslab)

    decoded = out[:B, 0:96].reshape(B, 1, 24, 4)
    encoded = out[:B, 96:104]
    return decoded, encoded


# ---------------------------------------------------------------------------
# Deterministic parameter init (PyTorch-style uniform(-1/sqrt(fan_in), ...))
# ---------------------------------------------------------------------------
def init_params():
    keys = jax.random.split(jax.random.PRNGKey(0), 13)

    def uni(k, shape, fan_in):
        bnd = 1.0 / float(np.sqrt(fan_in))
        return np.asarray(jax.random.uniform(k, shape, jnp.float32, -bnd, bnd))

    p = {}
    p["conv1_w"] = uni(keys[0], (2, 1, 2, 2), 4)   # Conv2d(1,2,k=2,p=1)
    p["conv1_b"] = uni(keys[1], (2,), 4)
    p["conv2_w"] = uni(keys[2], (4, 2, 2, 2), 8)   # Conv2d(2,4,k=2,p=1)
    p["conv2_b"] = uni(keys[3], (4,), 8)
    p["fc_e_w"] = uni(keys[4], (8, 24), 24)        # Linear(24,8)
    p["fc_e_b"] = uni(keys[5], (8,), 24)
    p["fc_d_w"] = uni(keys[6], (24, 8), 8)         # Linear(8,24)
    p["fc_d_b"] = uni(keys[7], (24,), 8)
    p["ct1_w"] = uni(keys[8], (4, 2, 2, 2), 8)     # ConvTranspose2d(4,2,k=2,s=2)
    p["ct1_b"] = uni(keys[9], (2,), 8)
    p["ct2_w"] = uni(keys[10], (2, 1, 2, 2), 4)    # ConvTranspose2d(2,1,k=2,s=2)
    p["ct2_b"] = uni(keys[11], (1,), 4)
    return p, keys[12]


# ---------------------------------------------------------------------------
# Pure-numpy reference implementing the PyTorch module definitions directly
# ---------------------------------------------------------------------------
def reference_forward(x, p):
    def relu(a):
        return np.maximum(a, 0.0)

    def conv2d(x, w, b, pad):
        B, Cin, H, W = x.shape
        Cout, _, kh, kw = w.shape
        Ho, Wo = H + 2 * pad - kh + 1, W + 2 * pad - kw + 1
        xp = np.zeros((B, Cin, H + 2 * pad, W + 2 * pad), np.float32)
        xp[:, :, pad:pad + H, pad:pad + W] = x
        y = np.zeros((B, Cout, Ho, Wo), np.float32)
        for co in range(Cout):
            for ho in range(Ho):
                for wo in range(Wo):
                    y[:, co, ho, wo] = (xp[:, :, ho:ho + kh, wo:wo + kw]
                                        * w[co]).sum(axis=(1, 2, 3)) + b[co]
        return y

    def maxpool2(x):
        B, C, H, W = x.shape
        Ho, Wo = H // 2, W // 2
        y = np.zeros((B, C, Ho, Wo), np.float32)
        for ho in range(Ho):
            for wo in range(Wo):
                y[:, :, ho, wo] = x[:, :, 2 * ho:2 * ho + 2,
                                    2 * wo:2 * wo + 2].max(axis=(2, 3))
        return y

    def convT2d(x, w, b, stride):
        B, Cin, H, W = x.shape
        _, Cout, kh, kw = w.shape
        Ho, Wo = (H - 1) * stride + kh, (W - 1) * stride + kw
        y = np.zeros((B, Cout, Ho, Wo), np.float32)
        for ci in range(Cin):
            for hi in range(H):
                for wi in range(W):
                    for dh in range(kh):
                        for dw in range(kw):
                            y[:, :, hi * stride + dh, wi * stride + dw] += (
                                x[:, ci, hi, wi][:, None] * w[ci, :, dh, dw][None, :])
        for co in range(Cout):
            y[:, co] += b[co]
        return y

    h = relu(conv2d(x, p["conv1_w"], p["conv1_b"], pad=1))
    h = maxpool2(h)
    h = relu(conv2d(h, p["conv2_w"], p["conv2_b"], pad=1))
    h = maxpool2(h)
    hf = h.reshape(h.shape[0], -1)
    enc = hf @ p["fc_e_w"].T + p["fc_e_b"]
    d = relu(enc @ p["fc_d_w"].T + p["fc_d_b"])
    d = d.reshape(-1, 4, 6, 1)
    d = relu(convT2d(d, p["ct1_w"], p["ct1_b"], 2))
    dec = convT2d(d, p["ct2_w"], p["ct2_b"], 2)
    return dec, enc


if __name__ == "__main__":
    params, xkey = init_params()

    # --- exact-precision path (f32 matmuls, f32 output): tight check of fold/pack ---
    w32, b32 = build_kernel_weights(params, matmul_dtype=jnp.float32)

    B = 2
    x = jax.random.normal(xkey, (B, 1, 24, 1), jnp.float32)
    dec, enc = autoencoder_forward(x, w32, b32)
    dec = jax.block_until_ready(dec)
    enc = jax.block_until_ready(enc)
    dec_ref, enc_ref = reference_forward(np.asarray(x), params)
    assert dec.shape == (B, 1, 24, 4) and enc.shape == (B, 8)
    assert np.allclose(np.asarray(dec), dec_ref, atol=2e-4, rtol=2e-4)
    assert np.allclose(np.asarray(enc), enc_ref, atol=2e-4, rtol=2e-4)

    # --- multi-tile parallel grid path (grid=2, chunked, padded batch), exact f32 ---
    B2 = 600
    x2 = jax.random.normal(jax.random.PRNGKey(1), (B2, 1, 24, 1), jnp.float32)
    dec2, enc2 = autoencoder_forward(x2, w32, b32)
    dec2 = jax.block_until_ready(dec2)
    enc2 = jax.block_until_ready(enc2)
    dec2_ref, enc2_ref = reference_forward(np.asarray(x2), params)
    assert np.allclose(np.asarray(dec2), dec2_ref, atol=2e-4, rtol=2e-4)
    assert np.allclose(np.asarray(enc2), enc2_ref, atol=2e-4, rtol=2e-4)

    # --- fast path (bf16 matmuls + bf16 output writeback): loose sanity check ---
    wbf, bbf = build_kernel_weights(params, matmul_dtype=jnp.bfloat16)
    decb, encb = autoencoder_forward(x, wbf, bbf)
    decb = jax.block_until_ready(decb)
    encb = jax.block_until_ready(encb)
    assert np.allclose(np.asarray(decb.astype(jnp.float32)), dec_ref, atol=1e-1, rtol=1e-1)
    assert np.allclose(np.asarray(encb.astype(jnp.float32)), enc_ref, atol=1e-1, rtol=1e-1)

    print("KERNEL_OK")
</pallas_src>

<mosaic_0001>
module attributes {stable_mosaic.version = 11 : i64} {
  func.func @ae_kernel(%arg0: i32, %arg1: memref<8x24xf32, #tpu.memory_space<vmem>>, %arg2: memref<176x128xf32, #tpu.memory_space<vmem>>, %arg3: memref<8x128xf32, #tpu.memory_space<vmem>>, %arg4: memref<8x128xf32, #tpu.memory_space<vmem>>) attributes {dimension_semantics = [#tpu.dimension_semantics<parallel>], iteration_bounds = array<i64: 1>, scalar_prefetch = 0 : i64, scratch_operands = 0 : i64, tpu.core_type = #tpu.core_type<tc>, window_params = [{transform_indices = @transform_0, window_bounds = array<i64: 8, 24>}, {pipeline_mode = #tpu.pipeline_mode<synchronous>, transform_indices = @transform_1, window_bounds = array<i64: 176, 128>}, {pipeline_mode = #tpu.pipeline_mode<synchronous>, transform_indices = @transform_2, window_bounds = array<i64: 8, 128>}, {transform_indices = @transform_3, window_bounds = array<i64: 8, 128>}]} {
    %c0 = arith.constant 0 : index
    %c0_0 = arith.constant 0 : index
    %0 = vector.load %arg3[%c0, %c0_0] : memref<8x128xf32, #tpu.memory_space<vmem>>, vector<1x96xf32>
    %c1 = arith.constant 1 : index
    %c0_1 = arith.constant 0 : index
    %1 = vector.load %arg3[%c1, %c0_1] : memref<8x128xf32, #tpu.memory_space<vmem>>, vector<1x96xf32>
    %c2 = arith.constant 2 : index
    %c0_2 = arith.constant 0 : index
    %2 = vector.load %arg3[%c2, %c0_2] : memref<8x128xf32, #tpu.memory_space<vmem>>, vector<1x128xf32>
    %c3 = arith.constant 3 : index
    %c0_3 = arith.constant 0 : index
    %3 = vector.load %arg3[%c3, %c0_3] : memref<8x128xf32, #tpu.memory_space<vmem>>, vector<1x48xf32>
    %c4 = arith.constant 4 : index
    %c0_4 = arith.constant 0 : index
    %4 = vector.load %arg3[%c4, %c0_4] : memref<8x128xf32, #tpu.memory_space<vmem>>, vector<1x128xf32>
    %c0_i32 = arith.constant 0 : i32
    %c8_i32 = arith.constant 8 : i32
    %5 = arith.muli %c0_i32, %c8_i32 : i32
    %6 = tpu.assume_multiple %5, 8 : i32
    %7 = arith.index_cast %6 : i32 to index
    %c0_5 = arith.constant 0 : index
    %8 = vector.load %arg1[%7, %c0_5] : memref<8x24xf32, #tpu.memory_space<vmem>>, vector<8x24xf32>
    %c0_6 = arith.constant 0 : index
    %c0_7 = arith.constant 0 : index
    %9 = vector.load %arg2[%c0_6, %c0_7] : memref<176x128xf32, #tpu.memory_space<vmem>>, vector<24x96xf32>
    %cst = arith.constant dense<0.000000e+00> : vector<8x96xf32>
    %10 = tpu.matmul %8, %9, %cst {dimension_numbers = #tpu.dot_dimension_numbers<[1], [0], [0], [1], [0, 0, 1, 1], [], []>} : vector<8x24xf32>, vector<24x96xf32>, vector<8x96xf32> -> vector<8x96xf32>
    %11 = vector.broadcast %0 : vector<1x96xf32> to vector<8x96xf32>
    %12 = arith.addf %10, %11 : vector<8x96xf32>
    %cst_8 = arith.constant 0.000000e+00 : f32
    %13 = vector.broadcast %cst_8 : f32 to vector<8x96xf32>
    %14 = arith.maximumf %12, %13 : vector<8x96xf32>
    %15 = vector.extract_strided_slice %14 {offsets = [0, 0], sizes = [8, 24], strides = [1, 1]} : vector<8x96xf32> to vector<8x24xf32>
    %16 = vector.extract_strided_slice %14 {offsets = [0, 24], sizes = [8, 24], strides = [1, 1]} : vector<8x96xf32> to vector<8x24xf32>
    %17 = arith.maximumf %15, %16 : vector<8x24xf32>
    %18 = vector.extract_strided_slice %14 {offsets = [0, 48], sizes = [8, 24], strides = [1, 1]} : vector<8x96xf32> to vector<8x24xf32>
    %19 = vector.extract_strided_slice %14 {offsets = [0, 72], sizes = [8, 24], strides = [1, 1]} : vector<8x96xf32> to vector<8x24xf32>
    %20 = arith.maximumf %18, %19 : vector<8x24xf32>
    %21 = arith.maximumf %17, %20 : vector<8x24xf32>
    %c32 = arith.constant 32 : index
    %c0_9 = arith.constant 0 : index
    %22 = vector.load %arg2[%c32, %c0_9] : memref<176x128xf32, #tpu.memory_space<vmem>>, vector<24x96xf32>
    %cst_10 = arith.constant dense<0.000000e+00> : vector<8x96xf32>
    %23 = tpu.matmul %21, %22, %cst_10 {dimension_numbers = #tpu.dot_dimension_numbers<[1], [0], [0], [1], [0, 0, 1, 1], [], []>} : vector<8x24xf32>, vector<24x96xf32>, vector<8x96xf32> -> vector<8x96xf32>
    %24 = vector.broadcast %1 : vector<1x96xf32> to vector<8x96xf32>
    %25 = arith.addf %23, %24 : vector<8x96xf32>
    %cst_11 = arith.constant 0.000000e+00 : f32
    %26 = vector.broadcast %cst_11 : f32 to vector<8x96xf32>
    %27 = arith.maximumf %25, %26 : vector<8x96xf32>
    %28 = vector.extract_strided_slice %27 {offsets = [0, 0], sizes = [8, 24], strides = [1, 1]} : vector<8x96xf32> to vector<8x24xf32>
    %29 = vector.extract_strided_slice %27 {offsets = [0, 24], sizes = [8, 24], strides = [1, 1]} : vector<8x96xf32> to vector<8x24xf32>
    %30 = arith.maximumf %28, %29 : vector<8x24xf32>
    %31 = vector.extract_strided_slice %27 {offsets = [0, 48], sizes = [8, 24], strides = [1, 1]} : vector<8x96xf32> to vector<8x24xf32>
    %32 = vector.extract_strided_slice %27 {offsets = [0, 72], sizes = [8, 24], strides = [1, 1]} : vector<8x96xf32> to vector<8x24xf32>
    %33 = arith.maximumf %31, %32 : vector<8x24xf32>
    %34 = arith.maximumf %30, %33 : vector<8x24xf32>
    %c64 = arith.constant 64 : index
    %c0_12 = arith.constant 0 : index
    %35 = vector.load %arg2[%c64, %c0_12] : memref<176x128xf32, #tpu.memory_space<vmem>>, vector<24x128xf32>
    %cst_13 = arith.constant dense<0.000000e+00> : vector<8x128xf32>
    %36 = tpu.matmul %34, %35, %cst_13 {dimension_numbers = #tpu.dot_dimension_numbers<[1], [0], [0], [1], [0, 0, 1, 1], [], []>} : vector<8x24xf32>, vector<24x128xf32>, vector<8x128xf32> -> vector<8x128xf32>
    %37 = vector.broadcast %2 : vector<1x128xf32> to vector<8x128xf32>
    %38 = arith.addf %36, %37 : vector<8x128xf32>
    %39 = vector.extract_strided_slice %38 {offsets = [0, 104], sizes = [8, 24], strides = [1, 1]} : vector<8x128xf32> to vector<8x24xf32>
    %cst_14 = arith.constant 0.000000e+00 : f32
    %40 = vector.broadcast %cst_14 : f32 to vector<8x24xf32>
    %41 = arith.maximumf %39, %40 : vector<8x24xf32>
    %c96 = arith.constant 96 : index
    %c0_15 = arith.constant 0 : index
    %42 = vector.load %arg2[%c96, %c0_15] : memref<176x128xf32, #tpu.memory_space<vmem>>, vector<24x48xf32>
    %cst_16 = arith.constant dense<0.000000e+00> : vector<8x48xf32>
    %43 = tpu.matmul %41, %42, %cst_16 {dimension_numbers = #tpu.dot_dimension_numbers<[1], [0], [0], [1], [0, 0, 1, 1], [], []>} : vector<8x24xf32>, vector<24x48xf32>, vector<8x48xf32> -> vector<8x48xf32>
    %44 = vector.broadcast %3 : vector<1x48xf32> to vector<8x48xf32>
    %45 = arith.addf %43, %44 : vector<8x48xf32>
    %cst_17 = arith.constant 0.000000e+00 : f32
    %46 = vector.broadcast %cst_17 : f32 to vector<8x48xf32>
    %47 = arith.maximumf %45, %46 : vector<8x48xf32>
    %c128 = arith.constant 128 : index
    %c0_18 = arith.constant 0 : index
    %48 = vector.load %arg2[%c128, %c0_18] : memref<176x128xf32, #tpu.memory_space<vmem>>, vector<48x128xf32>
    %cst_19 = arith.constant dense<0.000000e+00> : vector<8x128xf32>
    %49 = tpu.matmul %47, %48, %cst_19 {dimension_numbers = #tpu.dot_dimension_numbers<[1], [0], [0], [1], [0, 0, 1, 1], [], []>} : vector<8x48xf32>, vector<48x128xf32>, vector<8x128xf32> -> vector<8x128xf32>
    %50 = vector.broadcast %4 : vector<1x128xf32> to vector<8x128xf32>
    %51 = arith.addf %49, %50 : vector<8x128xf32>
    %52 = arith.addf %51, %38 : vector<8x128xf32>
    %53 = arith.index_cast %6 : i32 to index
    %c0_20 = arith.constant 0 : index
    %54 = vector.load %arg4[%53, %c0_20] : memref<8x128xf32, #tpu.memory_space<vmem>>, vector<8x128xf32>
    tpu.vector_store %arg4[%53, %c0_20], %52 {strides = array<i32>} : memref<8x128xf32, #tpu.memory_space<vmem>>, vector<8x128xf32>,
    %c1_i32 = arith.constant 1 : i32
    return
  }
  func.func @transform_0(%arg0: i32) -> (i32, i32) {
    %c0_i32 = arith.constant 0 : i32
    %c0_i32_0 = arith.constant 0 : i32
    return %arg0, %c0_i32 : i32, i32
  }
  func.func @transform_1(%arg0: i32) -> (i32, i32) {
    %c0_i32 = arith.constant 0 : i32
    %c0_i32_0 = arith.constant 0 : i32
    %c0_i32_1 = arith.constant 0 : i32
    return %c0_i32, %c0_i32_0 : i32, i32
  }
  func.func @transform_2(%arg0: i32) -> (i32, i32) {
    %c0_i32 = arith.constant 0 : i32
    %c0_i32_0 = arith.constant 0 : i32
    %c0_i32_1 = arith.constant 0 : i32
    return %c0_i32, %c0_i32_0 : i32, i32
  }
  func.func @transform_3(%arg0: i32) -> (i32, i32) {
    %c0_i32 = arith.constant 0 : i32
    %c0_i32_0 = arith.constant 0 : i32
    return %arg0, %c0_i32 : i32, i32
  }
}

</mosaic_0001>

<bundles_post_ra>
// kernel: tpu_custom_call.1
= control target key start
LH: loop header
LB: loop body
LE: loop exit
PB: predicated region body
PF: predicated region fallthrough
CT: control target
= control target key end

     0   :  { %8 = vsyncpa [#allocation3], 0  ;;  %s823_s0 = inlined_call_operand.hbm [shape: f32[8,24], index: 0, kind: input, shape index: {}]   ;;  %s824_s1 = inlined_call_operand.hbm [shape: f32[176,128], index: 1, kind: input, shape index: {}]   ;;  %s825_s2 = inlined_call_operand.hbm [shape: f32[8,128], index: 2, kind: input, shape index: {}]   ;;  %s826_s3 = inlined_call_operand.hbm [shape: f32[8,128], index: 3, kind: output, shape index: {}]  }
   0x1   :  { %9 = vsyncpa [#allocation6], 0 }
   0x2   :  { %10 = vsyncpa [#allocation4], 0  ;;  %s718_s12 = smov [#allocation5]   ;;  %s624_s16 = scalar_lea.hbm %s824_s1, 2816 }
   0x3   :  { %s26_s13 = sshll.u32 %s718_s12, 4  ;;  %p625_p0 = scmp.ne.s32.totalorder %s824_s1, %s624_s16  ;;  %s27_s13 = int_to_ptr.vmem [resolvable:$true] %s26_s13 }
   0x4   :  { %p628_p1 = scmp.lt.u32.totalorder %s624_s16, %s824_s1 }
   0x6   :  { %p630_p2 = pnand %p628_p1, %p625_p0 }
   0x8   :  { %633 = shalt.err (!%p630_p2)
}
   0x9   :  { %s634_s21 = scalar_lea.vmem %s27_s13, 2816  ;;  %p639_p4 = scmp.lt.s32.totalorder %s27_s13, %s27_s13 }
   0xa   :  { %p635_p3 = scmp.ne.s32.totalorder %s27_s13, %s634_s21  ;;  %p640_p5 = scmp.lt.s32.totalorder %s634_s21, %s634_s21 }
   0xc   :  { %p641_p6 = por %p640_p5, %p639_p4 }
   0xe   :  { %p642_p7 = pnand %p641_p6, %p635_p3 }
  0x10   :  { %645 = shalt.err (!%p642_p7)
}
  0x11   :  { %s719_s22 = smov 128   ;;  %s720_s23 = smov 8  }
  0x12   :  { %32 = dma.hbm_to_vmem [thread:$0]  %s824_s1, 2816, %s27_s13, [#allocation6], %s719_s22, %s719_s22, %s720_s23  }
  0x13   :  { %s721_s26 = smov [#allocation2]   ;;  %s722_s28 = smov [#allocation7]  }
  0x14   :  { %s17_s27 = sshll.u32 %s721_s26, 4  ;;  %s39_s29 = sshll.u32 %s722_s28, 4  ;;  %s18_s27 = int_to_ptr.vmem [resolvable:$true] %s17_s27  ;;  %s40_s29 = int_to_ptr.vmem [resolvable:$true] %s39_s29 }
  0x15   :  { %s646_s5 = scalar_lea.hbm %s823_s0, 128 }
  0x16   :  { %p647_p8 = scmp.ne.s32.totalorder %s823_s0, %s646_s5  ;;  %p650_p9 = scmp.lt.u32.totalorder %s646_s5, %s823_s0 }
  0x18   :  { %p652_p10 = pnand %p650_p9, %p647_p8 }
  0x1a   :  { %655 = shalt.err (!%p652_p10)
}
  0x1b   :  { %s656_s1 = scalar_lea.vmem %s18_s27, 128  ;;  %p661_p12 = scmp.lt.s32.totalorder %s18_s27, %s18_s27 }
  0x1c   :  { %p657_p11 = scmp.ne.s32.totalorder %s18_s27, %s656_s1  ;;  %p662_p13 = scmp.lt.s32.totalorder %s656_s1, %s656_s1 }
  0x1e   :  { %p663_p0 = por %p662_p13, %p661_p12 }
  0x20   :  { %p664_p1 = pnand %p663_p0, %p657_p11 }
  0x22   :  { %667 = shalt.err (!%p664_p1)
}
  0x23   :  { %20 = dma.hbm_to_vmem [thread:$0]  %s823_s0, 128, %s18_s27, [#allocation3]  }
  0x24   :  { %s668_s14 = scalar_lea.hbm %s825_s2, 128 }
  0x25   :  { %p669_p2 = scmp.ne.s32.totalorder %s825_s2, %s668_s14  ;;  %p672_p3 = scmp.lt.u32.totalorder %s668_s14, %s825_s2 }
  0x27   :  { %p674_p4 = pnand %p672_p3, %p669_p2 }
  0x29   :  { %677 = shalt.err (!%p674_p4)
}
  0x2a   :  { %s678_s19 = scalar_lea.vmem %s40_s29, 128  ;;  %p683_p6 = scmp.lt.s32.totalorder %s40_s29, %s40_s29 }
  0x2b   :  { %p679_p5 = scmp.ne.s32.totalorder %s40_s29, %s678_s19  ;;  %p684_p7 = scmp.lt.s32.totalorder %s678_s19, %s678_s19 }
  0x2d   :  { %p685_p8 = por %p684_p7, %p683_p6 }
  0x2f   :  { %p686_p9 = pnand %p685_p8, %p679_p5 }
  0x31   :  { %689 = shalt.err (!%p686_p9)
}
  0x32   :  { %42 = dma.hbm_to_vmem [thread:$0]  %s825_s2, 128, %s40_s29, [#allocation6]  }
  0x33   :  { %712 = dma.done.wait [#allocation3], 128  }
  0x34   :  { %713 = vsyncadd [#allocation3], 4294967168 }
  0x35   :  { %714 = dma.done.wait [#allocation6], 2944  }
  0x36   :  { %715 = vsyncadd [#allocation6], 4294964352  ;;  %v723_v0 = vmov 0.0|0.0   ;;  %vm724_vm0 = vmmov 0   ;;  %v725_v1 = vmov 0.0   ;;  %v58_v2 = vld [vmem:[#allocation5] sm:$0xff] }
  0x37   :  { %591 = vmatprep.subr.bf16.mxu1 %v723_v0  ;;  %546 = vmatprep.mubr.msk.f32.mxu1 %vm724_vm0, %v725_v1  ;;  %v59_v3 = vld [vmem:[#allocation5 + $0x8] sm:$0xff]  ;;  %v60_v5 = vld [vmem:[#allocation5 + $0x10] sm:$0xff]  ;;  %v57_v6 = vld [vmem:[#allocation2] sm:$0xff]  ;;  %vm65_vm1 = vcmask 195584   ;;  %s726_s2 = smov 104   ;;  %s727_s21 = smov 80  }
  0x38   :  { %597 = vmatprep.subr.bf16.mxu0 %v723_v0  ;;  %564 = vmatprep.mubr.msk.f32.mxu0 %vm724_vm0, %v725_v1  ;;  %v592_v4 = vpack.c.bf16 %v59_v3, %v58_v2  ;;  %v150_v7 = vld [vmem:[#allocation5 + $0x20] sm:$0xff]  ;;  %v151_v8 = vld [vmem:[#allocation5 + $0x28] sm:$0xff]  ;;  %v507_v10 = vld [vmem:[#allocation7] ss:$0 sm:$0xff]  ;;  %s728_s22 = smov 24   ;;  %vm415_vm2 = vcmask 392192  }
  0x39   :  { %v595_v9 = vpack.c.bf16 %v151_v8, %v150_v7  ;;  %v152_v15 = vld [vmem:[#allocation5 + $0x30] sm:$0xff]  ;;  %v241_v20 = vld [vmem:[#allocation5 + $0x40] sm:$0xff]  ;;  %v242_v21 = vld [vmem:[#allocation5 + $0x48] sm:$0xff]  ;;  %s729_s23 = smov [#allocation8]  }
  0x3a   :  { %593 = vmatpush3.bf16.msra.mxu1 %v592_v4  ;;  %v598_v22 = vpack.c.bf16 %v242_v21, %v241_v20  ;;  %v509_v23 = vld [vmem:[#allocation7 + $0x1] ss:$0 sm:$0xff]  ;;  %v322_v33 = vld [vmem:[#allocation5 + $0x60] sm:$0xff]  ;;  %v323_v34 = vld [vmem:[#allocation5 + $0x68] sm:$0xff]  ;;  %s497_s24 = sshll.u32 %s729_s23, 4  ;;  %s498_s24 = int_to_ptr.vmem [resolvable:$true] %s497_s24 }
  0x3b   :  { %544 = vmatprep.subr.mxu1 %v725_v1  ;;  %v243_v28 = vld [vmem:[#allocation5 + $0x50] sm:$0xff]  ;;  %v601_v35 = vpack.c.bf16 %v323_v34, %v322_v33  ;;  %v405_v37 = vld [vmem:[#allocation5 + $0x80] sm:$0xff]  ;;  %v406_v38 = vld [vmem:[#allocation5 + $0x88] sm:$0xff]  ;;  %s690_s25 = scalar_lea.vmem %s498_s24, 128  ;;  %p695_p11 = scmp.lt.s32.totalorder %s498_s24, %s498_s24 }
  0x3c   :  { %599 = vmatpush3.bf16.msra.mxu0 %v598_v22  ;;  %v324_v36 = vld [vmem:[#allocation5 + $0x70] sm:$0xff]  ;;  %v604_v40 = vpack.c.bf16 %v406_v38, %v405_v37  ;;  %v408_v41 = vld [vmem:[#allocation5 + $0x98] sm:$0xff]  ;;  %v409_v49 = vld [vmem:[#allocation5 + $0xa0] sm:$0xff]  ;;  %p691_p10 = scmp.ne.s32.totalorder %s498_s24, %s690_s25  ;;  %p696_p12 = scmp.lt.s32.totalorder %s690_s25, %s690_s25 }
  0x3d   :  { %562 = vmatprep.subr.mxu0 %v725_v1  ;;  %v407_v39 = vld [vmem:[#allocation5 + $0x90] sm:$0xff]  ;;  %v410_v50 = vld [vmem:[#allocation5 + $0xa8] sm:$0xff] }
  0x3e   :  { %545 = vmatpush3.msra.mxu1 %v60_v5  ;;  %v607_v42 = vpack.c.bf16 %v408_v41, %v407_v39  ;;  %v511_v43 = vld [vmem:[#allocation7 + $0x2] ss:$0 sm:$0xff]  ;;  %v610_v51 = vpack.c.bf16 %v410_v50, %v409_v49  ;;  %v513_v52 = vld [vmem:[#allocation7 + $0x3] ss:$0 sm:$0xff]  ;;  %v515_v57 = vld [vmem:[#allocation7 + $0x4] ss:$0 sm:$0xff]  ;;  %p697_p13 = por %p696_p12, %p695_p11 }
  0x3f   :  { %547 = vmatmul.mubr.msk.f32.vlgmr.msra.gmra.mrb[0].mxu1 %vm65_vm1, %v57_v6  ;;  %594 = vmatprep.subr.bf16.mxu1 %v723_v0 }
  0x40   :  { %555 = vmatprep.mubr.msk.f32.mxu1 %vm724_vm0, %v725_v1  ;;  %596 = vmatpush3.bf16.msra.mxu1 %v595_v9  ;;  %p698_p0 = pnand %p697_p13, %p691_p10 }
  0x41   :  { %553 = vmatprep.subr.mxu1 %v725_v1  ;;  %563 = vmatpush3.msra.mxu0 %v243_v28 }
  0x42   :  { %603 = vmatprep.subr.bf16.mxu0 %v723_v0 }
  0x44   :  { %554 = vmatpush3.msra.mxu1 %v152_v15 }
  0x45   :  { %600 = vmatprep.subr.bf16.mxu1 %v723_v0 }
 0x112   :  { %v135_v11 = vpop.f32.mrb[0].mxu1 }
 0x113   :  { %v136_v12 = vadd.f32 %v507_v10, %v135_v11  ;;  %v548_v13 = vpop.f32.mrb[1].mxu1 }
 0x115   :  { %v139_v14 = vmax.f32 %v136_v12, 0.0 }
 0x117   :  { %141 = vrot.lane.b32.xlu0 %v139_v14, %s726_s2 }
 0x189   :  { %v142_v16 = vpop.permute.xlu0 %141 }
 0x18a   :  { %v144_v17 = vmax.f32 %v139_v14, %v142_v16 }
 0x18c   :  { %146 = vrot.lane.b32.xlu0 %v144_v17, %s727_s21 }
 0x1fe   :  { %v147_v18 = vpop.permute.xlu0 %146 }
 0x1ff   :  { %v149_v19 = vmax.f32 %v144_v17, %v147_v18 }
 0x201   :  { %556 = vmatmul.mubr.msk.f32.vlgmr.msra.gmra.mrb[2].mxu1 %vm65_vm1, %v149_v19 }
 0x202   :  { %573 = vmatprep.mubr.msk.f32.mxu1 %vm724_vm0, %v725_v1  ;;  %602 = vmatpush3.bf16.msra.mxu1 %v601_v35 }
 0x203   :  { %571 = vmatprep.subr.mxu1 %v725_v1 }
 0x206   :  { %572 = vmatpush3.msra.mxu1 %v324_v36 }
 0x2d4   :  { %v226_v24 = vpop.f32.mrb[2].mxu1 }
 0x2d5   :  { %v227_v25 = vadd.f32 %v509_v23, %v226_v24  ;;  %v557_v26 = vpop.f32.mrb[3].mxu1 }
 0x2d7   :  { %v230_v27 = vmax.f32 %v227_v25, 0.0 }
 0x2d9   :  { %232 = vrot.lane.b32.xlu1 %v230_v27, %s726_s2 }
 0x34b   :  { %v233_v29 = vpop.permute.xlu1 %232 }
 0x34c   :  { %v235_v30 = vmax.f32 %v230_v27, %v233_v29 }
 0x34e   :  { %237 = vrot.lane.b32.xlu1 %v235_v30, %s727_s21 }
 0x3c0   :  { %v238_v31 = vpop.permute.xlu1 %237 }
 0x3c1   :  { %v240_v32 = vmax.f32 %v235_v30, %v238_v31 }
 0x3c3   :  { %565 = vmatmul.mubr.msk.f32.vlgmr.msra.gmra.mrb[0].mxu0 %vm65_vm1, %v240_v32 }
 0x3c4   :  { %588 = vmatprep.mubr.msk.f32.mxu0 %vm724_vm0, %v725_v1  ;;  %605 = vmatpush3.bf16.msra.mxu0 %v604_v40 }
 0x3c5   :  { %606 = vmatprep.subr.bf16.mxu0 %v723_v0 }
 0x3c8   :  { %608 = vmatpush3.bf16.msra.mxu0 %v607_v42 }
 0x3c9   :  { %609 = vmatprep.subr.bf16.mxu0 %v723_v0 }
 0x3cc   :  { %611 = vmatpush3.bf16.msra.mxu0 %v610_v51 }
 0x496   :  { %v317_v44 = vpop.f32.mrb[0].mxu0 }
 0x497   :  { %v318_v45 = vadd.f32 %v511_v43, %v317_v44  ;;  %v566_v46 = vpop.f32.mrb[1].mxu0 }
 0x499   :  { %v321_v47 = vmax.f32 %v318_v45, 0.0 }
 0x49b   :  { %330 = vrot.lane.b32.xlu0 %v321_v47, %s728_s22 }
 0x50d   :  { %v331_v48 = vpop.permute.xlu0 %330 }
 0x50e   :  { %574 = vmatmul.mubr.msk.f32.vlgmr.msra.gmra.mrb[4].mxu1 %vm65_vm1, %v331_v48 }
 0x5e1   :  { %v400_v53 = vpop.f32.mrb[4].mxu1 }
 0x5e2   :  { %v401_v54 = vadd.f32 %v513_v52, %v400_v53  ;;  %v575_v55 = vpop.f32.mrb[5].mxu1 }
 0x5e4   :  { %v404_v56 = vmax.f32 %v401_v54, 0.0 }
 0x5e6   :  { %589 = vmatmul.mubr.msk.f32.vlgmr.msra.gmra.mrb[2].mxu0 %vm415_vm2, %v404_v56 }
 0x6b9   :  { %v485_v58 = vpop.f32.mrb[2].mxu0 }
 0x6ba   :  { %v486_v59 = vadd.f32 %v515_v57, %v485_v58  ;;  %v590_v60 = vpop.f32.mrb[3].mxu0 }
 0x6bc   :  { %v489_v61 = vadd.f32 %v486_v59, %v318_v45 }
 0x6be   :  { %490 = vst [vmem:[#allocation8] sm:$0xff] %v489_v61 }
 0x6bf   :  { %701 = shalt.err (!%p698_p0)
}
 0x6c0   :  { %s702_s28 = scalar_lea.hbm %s826_s3, 128 }
 0x6c1   :  { %p703_p1 = scmp.ne.s32.totalorder %s826_s3, %s702_s28  ;;  %p706_p2 = scmp.lt.u32.totalorder %s702_s28, %s826_s3 }
 0x6c3   :  { %p708_p3 = pnand %p706_p2, %p703_p1 }
 0x6c5   :  { %711 = shalt.err (!%p708_p3)
}
 0x6c6   :  { %500 = dma.vmem_to_hbm [thread:$0]  %s498_s24, 128, %s826_s3, [#allocation4]  }
 0x6c7   :  { %716 = dma.done.wait [#allocation4], 128  }
 0x6c8   :  { %717 = vsyncadd [#allocation4], 4294967168 }
 0x6c9   :  { %504 = vsyncpa [#allocation3], 1 }
 0x6ca   :  { %505 = vsyncpa [#allocation6], 1 }
 0x6cb   :  { %506 = vsyncpa [#allocation4], 1 }

</bundles_post_ra>
